<compile_context>
chip_gen: v7x
topology: tpu7x:2x2x1
jax: 0.10.0
libtpu: 0.0.40
codegen_flags: <defaults>
</compile_context>

<pallas_src>
import functools

import numpy as np
import jax
import jax.numpy as jnp
from jax.experimental import pallas as pl
from jax.experimental.pallas import tpu as pltpu


# The exact sequence of F.avg_pool1d calls from the PyTorch module.
POOL_CFGS = (
    dict(kernel=3, stride=3, padding=0, ceil_mode=False, count_include_pad=True),
    dict(kernel=4, stride=2, padding=2, ceil_mode=False, count_include_pad=True),
    dict(kernel=3, stride=1, padding=0, ceil_mode=False, count_include_pad=True),
    dict(kernel=5, stride=2, padding=2, ceil_mode=True,  count_include_pad=False),
    dict(kernel=3, stride=2, padding=1, ceil_mode=False, count_include_pad=True),
    dict(kernel=2, stride=1, padding=0, ceil_mode=True,  count_include_pad=True),
    dict(kernel=4, stride=1, padding=2, ceil_mode=False, count_include_pad=False),
)


def _out_len(L, kernel, stride, padding, ceil_mode):
    a = L + 2 * padding - kernel
    if ceil_mode:
        L_out = -((-a) // stride) + 1
        # PyTorch rule: last window must start inside input + left padding.
        if (L_out - 1) * stride >= L + padding:
            L_out -= 1
    else:
        L_out = a // stride + 1
    return L_out


def _pool_matrix(L_in, kernel, stride, padding, ceil_mode, count_include_pad):
    """Static (L_in, L_out) matrix W such that avg_pool1d(x) == x @ W.

    Mirrors PyTorch's avg_pool kernel semantics (window clipping at
    L_in + padding, count_include_pad divisor handling, ceil_mode rules).
    """
    L_out = _out_len(L_in, kernel, stride, padding, ceil_mode)
    W = np.zeros((L_in, L_out), dtype=np.float64)
    for j in range(L_out):
        hstart = j * stride - padding
        hend = min(hstart + kernel, L_in + padding)
        pool_size = hend - hstart
        hs = max(hstart, 0)
        he = min(hend, L_in)
        div = pool_size if count_include_pad else (he - hs)
        assert div > 0, "avg_pool1d window lies entirely in padding"
        W[hs:he, j] = 1.0 / float(div)
    return W, L_out


def _round_up(x, m):
    return -(-x // m) * m


@functools.lru_cache(maxsize=None)
def _composed_pool_matrix_np(L):
    """Compose the 7 pooling matrices (fp64 accumulate) -> (L, L_out) fp32."""
    W_total = np.eye(L, dtype=np.float64)
    L_cur = L
    for cfg in POOL_CFGS:
        W, L_cur = _pool_matrix(L_cur, **cfg)
        W_total = W_total @ W
    return W_total.astype(np.float32), L_cur


def _avgpool_kernel(x_ref, w_ref, o_ref):
    # One MXU pass per row tile: (TILE, L) @ (L, L_out) -> (TILE, L_out).
    o_ref[...] = jnp.dot(
        x_ref[...].astype(jnp.float32), w_ref[...],
        preferred_element_type=jnp.float32,
    ).astype(o_ref.dtype)


# Per-grid-step VMEM footprint target; fits comfortably under v5e's scoped
# default once vmem_limit_bytes is raised and under v7x's 64 MiB physical.
_VMEM_BUDGET = 28 * 1024 * 1024
_SMALL_FASTPATH_ELEMS = 64 * 1024


def avg_pool1d_chain(x, *, force_pallas=False):
    """Applies the 7 chained avg_pool1d ops. x: (N, C, L) float32."""
    N, C, L = x.shape
    W_np, L_out = _composed_pool_matrix_np(L)
    W = jnp.asarray(W_np)

    rows = N * C
    x2 = x.reshape(rows, L)

    # Tiny-problem fast path: a single XLA dot beats pallas_call launch cost.
    if not force_pallas and rows * L < _SMALL_FASTPATH_ELEMS:
        y = jnp.dot(x2, W, preferred_element_type=jnp.float32).astype(x.dtype)
        return y.reshape(N, C, L_out)

    # --- weight buffering ------------------------------------------------
    w_bytes = L * L_out * 4
    single_buffer_w = w_bytes > 4 * 1024 * 1024  # only bother when W is big
    w_vmem = w_bytes * (1 if single_buffer_w else 2)
    # TODO(synk): for very large L, replace the dense composed W (O(L^2/24))
    # with its banded form (receptive field ~168 inputs/output) and grid over
    # output-column blocks so W stays VMEM-resident on v7x.

    # --- row-tile selection (VMEM-budgeted, overhead-amortizing) ----------
    per_row = 2 * 4 * (L + L_out)  # double-buffered x + out, fp32 bytes/row
    if rows <= 8:
        tile = rows  # block equals full row dim -> always legal
    else:
        tile = max(8, (_VMEM_BUDGET - w_vmem) // per_row)
        tile = min(tile, 2048, _round_up(rows, 8))
        if rows >= 16:
            # keep >= 2 grid steps so both v7x TensorCores get work
            tile = min(tile, _round_up(-(-rows // 2), 8))
        tile = min(_round_up(tile, 8), _round_up(rows, 8))

    grid = (pl.cdiv(rows, tile),)

    w_spec_kwargs = {}
    if single_buffer_w:
        # Constant index_map -> a second buffer is pure waste; reclaim VMEM.
        w_spec_kwargs["pipeline_mode"] = pl.Buffered(1)
    w_spec = pl.BlockSpec((L, L_out), lambda i: (0, 0), **w_spec_kwargs)

    out = pl.pallas_call(
        _avgpool_kernel,
        out_shape=jax.ShapeDtypeStruct((rows, L_out), x.dtype),
        grid_spec=pltpu.PrefetchScalarGridSpec(
            num_scalar_prefetch=0,
            grid=grid,
            in_specs=[
                pl.BlockSpec((tile, L), lambda i: (i, 0)),
                w_spec,  # VMEM-resident weight, constant block index
            ],
            # Last block dim equals the full L_out -> no 128-lane padding and
            # no post-call slice; garbage rows of a partial last input block
            # only affect rows that are never written back (row-independent op).
            out_specs=pl.BlockSpec((tile, L_out), lambda i: (i, 0)),
        ),
        compiler_params=pltpu.CompilerParams(
            dimension_semantics=("parallel",),
            vmem_limit_bytes=48 * 1024 * 1024,
        ),
    )(x2, W)

    return out.reshape(N, C, L_out)


# ---- pure-numpy reference (direct windowed sums, PyTorch semantics) ----
def _ref_avg_pool1d(x, kernel, stride, padding, ceil_mode, count_include_pad):
    N, C, L = x.shape
    L_out = _out_len(L, kernel, stride, padding, ceil_mode)
    out = np.zeros((N, C, L_out), dtype=x.dtype)
    for j in range(L_out):
        hstart = j * stride - padding
        hend = min(hstart + kernel, L + padding)
        pool_size = hend - hstart
        hs = max(hstart, 0)
        he = min(hend, L)
        div = pool_size if count_include_pad else (he - hs)
        out[:, :, j] = x[:, :, hs:he].sum(axis=-1) / float(div)
    return out


def _reference(x_np):
    y = x_np
    for cfg in POOL_CFGS:
        y = _ref_avg_pool1d(y, **cfg)
    return y


if __name__ == "__main__":
    # Small shape consistent with avg_pool1d input (N, C, L).
    x_small = jax.random.normal(jax.random.PRNGKey(0), (2, 4, 64), dtype=jnp.float32)

    # Force the Pallas path on the tiny test shape (the default wrapper would
    # take the XLA fast path) so the kernel itself is exercised.
    out_small = jax.block_until_ready(avg_pool1d_chain(x_small, force_pallas=True))
    ref_small = _reference(np.asarray(x_small))
    assert out_small.shape == ref_small.shape, (out_small.shape, ref_small.shape)
    np.testing.assert_allclose(np.asarray(out_small), ref_small, rtol=1e-5, atol=1e-5)

    # Larger shape that exercises the default multi-step tiled Pallas path.
    x_big = jax.random.normal(jax.random.PRNGKey(1), (16, 32, 256), dtype=jnp.float32)
    out_big = jax.block_until_ready(avg_pool1d_chain(x_big))
    ref_big = _reference(np.asarray(x_big))
    assert out_big.shape == ref_big.shape, (out_big.shape, ref_big.shape)
    np.testing.assert_allclose(np.asarray(out_big), ref_big, rtol=1e-5, atol=1e-5)

    print("KERNEL_OK")
</pallas_src>

<mosaic_0001>
module attributes {stable_mosaic.version = 11 : i64} {
  func.func @_avgpool_kernel(%arg0: i32, %arg1: memref<8x64xf32, #tpu.memory_space<vmem>>, %arg2: memref<64x3xf32, #tpu.memory_space<vmem>>, %arg3: memref<8x3xf32, #tpu.memory_space<vmem>>) attributes {dimension_semantics = [#tpu.dimension_semantics<parallel>], iteration_bounds = array<i64: 1>, scalar_prefetch = 0 : i64, scratch_operands = 0 : i64, tpu.core_type = #tpu.core_type<tc>, window_params = [{transform_indices = @transform_0, window_bounds = array<i64: 8, 64>}, {pipeline_mode = #tpu.pipeline_mode<synchronous>, transform_indices = @transform_1, window_bounds = array<i64: 64, 3>}, {transform_indices = @transform_2, window_bounds = array<i64: 8, 3>}]} {
    %c0 = arith.constant 0 : index
    %c0_0 = arith.constant 0 : index
    %0 = vector.load %arg1[%c0, %c0_0] : memref<8x64xf32, #tpu.memory_space<vmem>>, vector<8x64xf32>
    %c0_1 = arith.constant 0 : index
    %c0_2 = arith.constant 0 : index
    %1 = vector.load %arg2[%c0_1, %c0_2] : memref<64x3xf32, #tpu.memory_space<vmem>>, vector<64x3xf32>
    %cst = arith.constant dense<0.000000e+00> : vector<8x3xf32>
    %2 = tpu.matmul %0, %1, %cst {dimension_numbers = #tpu.dot_dimension_numbers<[1], [0], [0], [1], [0, 0, 1, 1], [], []>} : vector<8x64xf32>, vector<64x3xf32>, vector<8x3xf32> -> vector<8x3xf32>
    %c0_3 = arith.constant 0 : index
    %c0_4 = arith.constant 0 : index
    %3 = vector.load %arg3[%c0_3, %c0_4] : memref<8x3xf32, #tpu.memory_space<vmem>>, vector<8x3xf32>
    tpu.vector_store %arg3[%c0_3, %c0_4], %2 {strides = array<i32>} : memref<8x3xf32, #tpu.memory_space<vmem>>, vector<8x3xf32>,
    return
  }
  func.func @transform_0(%arg0: i32) -> (i32, i32) {
    %c0_i32 = arith.constant 0 : i32
    %c0_i32_0 = arith.constant 0 : i32
    return %arg0, %c0_i32 : i32, i32
  }
  func.func @transform_1(%arg0: i32) -> (i32, i32) {
    %c0_i32 = arith.constant 0 : i32
    %c0_i32_0 = arith.constant 0 : i32
    %c0_i32_1 = arith.constant 0 : i32
    return %c0_i32, %c0_i32_0 : i32, i32
  }
  func.func @transform_2(%arg0: i32) -> (i32, i32) {
    %c0_i32 = arith.constant 0 : i32
    %c0_i32_0 = arith.constant 0 : i32
    return %arg0, %c0_i32 : i32, i32
  }
}

</mosaic_0001>

<bundles_post_ra>
// kernel: tpu_custom_call.1
= control target key start
LH: loop header
LB: loop body
LE: loop exit
PB: predicated region body
PF: predicated region fallthrough
CT: control target
= control target key end

     0   :  { %v144_v0 = vmov 0.0|0.0   ;;  %vm145_vm0 = vmmov 0   ;;  %v146_v4 = vmov 0.0   ;;  %vm20_vm1 = vcmask 523264   ;;  %s192_s1 = inlined_call_operand.vmem [shape: f32[64,3], index: 1, kind: input, shape index: {}]   ;;  %s193_s0 = inlined_call_operand.vmem [shape: f32[8,64], index: 0, kind: input, shape index: {}]   ;;  %s194_s2 = inlined_call_operand.vmem [shape: f32[8,3], index: 2, kind: output, shape index: {}]  }
   0x1   :  { %129 = vmatprep.subr.bf16.mxu0 %v144_v0  ;;  %v12_v1 = vld [vmem:[%s192_s1] sm:$0xff]  ;;  %v13_v2 = vld [vmem:[%s192_s1 + $0x8] sm:$0xff]  ;;  %v14_v3 = vld [vmem:[%s192_s1 + $0x10] sm:$0xff]  ;;  %126 = vmatprep.mubr.msk.f32.mxu0 %vm145_vm0, %v146_v4  ;;  %vm94_vm2 = vcmask 23552  }
   0x2   :  { %v130_v5 = vpack.c.bf16 %v13_v2, %v12_v1  ;;  %v15_v6 = vld [vmem:[%s192_s1 + $0x18] sm:$0xff]  ;;  %v16_v8 = vld [vmem:[%s192_s1 + $0x20] sm:$0xff]  ;;  %v17_v9 = vld [vmem:[%s192_s1 + $0x28] sm:$0xff] }
   0x3   :  { %v133_v7 = vpack.c.bf16 %v15_v6, %v14_v3  ;;  %v136_v10 = vpack.c.bf16 %v17_v9, %v16_v8  ;;  %v18_v11 = vld [vmem:[%s192_s1 + $0x30] sm:$0xff]  ;;  %v19_v12 = vld [vmem:[%s192_s1 + $0x38] sm:$0xff]  ;;  %v11_v14 = vld [vmem:[%s193_s0] sm:$0xff] }
   0x4   :  { %131 = vmatpush3.bf16.msra.mxu0 %v130_v5  ;;  %v139_v13 = vpack.c.bf16 %v19_v12, %v18_v11 }
   0x5   :  { %132 = vmatprep.subr.bf16.mxu0 %v144_v0 }
   0x8   :  { %134 = vmatpush3.bf16.msra.mxu0 %v133_v7 }
   0x9   :  { %135 = vmatprep.subr.bf16.mxu0 %v144_v0 }
   0xc   :  { %137 = vmatpush3.bf16.msra.mxu0 %v136_v10 }
   0xd   :  { %138 = vmatprep.subr.bf16.mxu0 %v144_v0 }
  0x10   :  { %140 = vmatpush3.bf16.msra.mxu0 %v139_v13 }
  0x13   :  { %127 = vmatmul.mubr.msk.f32.vlgmr.msra.gmra.mrb[0].mxu0 %vm20_vm1, %v11_v14 }
  0xe6   :  { %v90_v15 = vpop.f32.mrb[0].mxu0 }
  0xe7   :  { %95 = vst.msk [vmem:[%s194_s2] sm:$0xff] %vm94_vm2, %v90_v15  ;;  %v128_v16 = vpop.f32.mrb[1].mxu0 }

</bundles_post_ra>
